<compile_context>
chip_gen: v6e
topology: v6e:2x2x1
jax: 0.10.0
libtpu: 0.0.40
codegen_flags: <defaults>
</compile_context>

<pallas_src>
import functools

import jax
import jax.numpy as jnp
from jax.experimental import pallas as pl
from jax.experimental.pallas import tpu as pltpu


def mlp_kernel(x_ref, w1_ref, b1_ref, w2_ref, b2_ref, o_ref):
    # Hidden layer: (TB, 896) bf16 @ (896, 256) bf16 -> f32 accumulate
    h = jnp.dot(x_ref[...], w1_ref[...], preferred_element_type=jnp.float32)
    # Bias + ReLU in f32 (VPU)
    h = jnp.maximum(h + b1_ref[...], 0.0)
    # Output layer: (TB, 256) bf16 @ (256, 128) bf16 -> f32 accumulate
    out = jnp.dot(h.astype(jnp.bfloat16), w2_ref[...],
                  preferred_element_type=jnp.float32)
    o_ref[...] = (out + b2_ref[...]).astype(o_ref.dtype)


@functools.partial(jax.jit, static_argnames=("tb",))
def mlp_forward(x, w1, b1, w2, b2, *, tb=128):
    """x: (B, 784) f32; w1: (784, 256); b1: (1, 256); w2: (256, 10); b2: (1, 10)."""
    B, K = x.shape
    H = w1.shape[1]
    O = w2.shape[1]

    # Pad to TPU-friendly extents (zeros do not change the math).
    K_pad = pl.cdiv(K, 128) * 128          # 784 -> 896
    O_pad = max(pl.cdiv(O, 128) * 128, 128)  # 10  -> 128
    n_tiles = pl.cdiv(B, tb)
    B_pad = n_tiles * tb                   # batch padded to a multiple of TB

    x_p = jnp.zeros((B_pad, K_pad), jnp.bfloat16).at[:B, :K].set(
        x.astype(jnp.bfloat16))
    w1_p = jnp.zeros((K_pad, H), jnp.bfloat16).at[:K, :].set(
        w1.astype(jnp.bfloat16))
    w2_p = jnp.zeros((H, O_pad), jnp.bfloat16).at[:, :O].set(
        w2.astype(jnp.bfloat16))
    b1_p = b1.astype(jnp.float32)
    b2_p = jnp.zeros((1, O_pad), jnp.float32).at[:, :O].set(
        b2.astype(jnp.float32))

    bytes_accessed = (
        B_pad * K_pad * 2          # x (bf16)
        + K_pad * H * 2            # w1 (bf16)
        + H * O_pad * 2            # w2 (bf16)
        + H * 4 + O_pad * 4        # biases (f32)
        + B_pad * O_pad * 4        # output (f32)
    )

    out_p = pl.pallas_call(
        mlp_kernel,
        out_shape=jax.ShapeDtypeStruct((B_pad, O_pad), jnp.float32),
        grid=(n_tiles,),
        in_specs=[
            # Streamed per batch tile (double-buffered by the pipeline).
            pl.BlockSpec((tb, K_pad), lambda i: (i, 0)),
            # Weights / biases: constant index_map -> VMEM-resident.
            pl.BlockSpec((K_pad, H), lambda i: (0, 0)),
            pl.BlockSpec((1, H), lambda i: (0, 0)),
            pl.BlockSpec((H, O_pad), lambda i: (0, 0)),
            pl.BlockSpec((1, O_pad), lambda i: (0, 0)),
        ],
        out_specs=pl.BlockSpec((tb, O_pad), lambda i: (i, 0)),
        compiler_params=pltpu.CompilerParams(
            dimension_semantics=("parallel",)),
        cost_estimate=pl.CostEstimate(
            flops=2 * B_pad * (K_pad * H + H * O_pad),
            transcendentals=0,
            bytes_accessed=bytes_accessed),
    )(x_p, w1_p, b1_p, w2_p, b2_p)

    # Strip batch and output-feature padding.
    return out_p[:B, :O]


def init_params(key):
    """Deterministic parameter init matching PyTorch nn.Linear shapes.

    PyTorch stores weight as (out, in); we store the transpose (in, out) so the
    kernel does x @ W directly.
    """
    k1, k2, k3, k4 = jax.random.split(key, 4)
    in1, hid, out = 784, 256, 10
    lim1 = 1.0 / jnp.sqrt(jnp.float32(in1))
    lim2 = 1.0 / jnp.sqrt(jnp.float32(hid))
    w1 = jax.random.uniform(k1, (in1, hid), jnp.float32, -lim1, lim1)
    b1 = jax.random.uniform(k2, (1, hid), jnp.float32, -lim1, lim1)
    w2 = jax.random.uniform(k3, (hid, out), jnp.float32, -lim2, lim2)
    b2 = jax.random.uniform(k4, (1, out), jnp.float32, -lim2, lim2)
    return w1, b1, w2, b2


if __name__ == "__main__":
    key = jax.random.PRNGKey(0)
    k_params, k_x = jax.random.split(key)

    w1, b1, w2, b2 = init_params(k_params)

    B = 8  # small batch (padded to the 128-row tile inside the wrapper)
    x = jax.random.normal(k_x, (B, 784), jnp.float32)

    out = mlp_forward(x, w1, b1, w2, b2)
    out = jax.block_until_ready(out)
    assert out.shape == (B, 10)

    # Reference with the same bf16 input rounding (f32 accumulation), matching
    # the kernel's precision choices.
    xb = x.astype(jnp.bfloat16).astype(jnp.float32)
    w1b = w1.astype(jnp.bfloat16).astype(jnp.float32)
    w2b = w2.astype(jnp.bfloat16).astype(jnp.float32)
    h_ref = jnp.maximum(xb @ w1b + b1, 0.0)
    ref = h_ref.astype(jnp.bfloat16).astype(jnp.float32) @ w2b + b2
    assert jnp.allclose(out, ref, atol=2e-2, rtol=2e-2), (
        float(jnp.max(jnp.abs(out - ref))))

    # Sanity check against the pure-f32 math as well (looser tolerance for the
    # bf16 matmul inputs).
    ref_f32 = jnp.maximum(x @ w1 + b1, 0.0) @ w2 + b2
    assert jnp.allclose(out, ref_f32, atol=5e-2, rtol=5e-2)

    print("KERNEL_OK")
</pallas_src>

<mosaic_0001>
module attributes {stable_mosaic.version = 11 : i64} {
  func.func @mlp_kernel(%arg0: i32, %arg1: memref<128x896xbf16, #tpu.memory_space<vmem>>, %arg2: memref<896x256xbf16, #tpu.memory_space<vmem>>, %arg3: memref<1x256xf32, #tpu.memory_space<vmem>>, %arg4: memref<256x128xbf16, #tpu.memory_space<vmem>>, %arg5: memref<1x128xf32, #tpu.memory_space<vmem>>, %arg6: memref<128x128xf32, #tpu.memory_space<vmem>>) attributes {dimension_semantics = [#tpu.dimension_semantics<parallel>], iteration_bounds = array<i64: 1>, scalar_prefetch = 0 : i64, scratch_operands = 0 : i64, tpu.core_type = #tpu.core_type<tc>, window_params = [{transform_indices = @transform_0, window_bounds = array<i64: 128, 896>}, {pipeline_mode = #tpu.pipeline_mode<synchronous>, transform_indices = @transform_1, window_bounds = array<i64: 896, 256>}, {pipeline_mode = #tpu.pipeline_mode<synchronous>, transform_indices = @transform_2, window_bounds = array<i64: 1, 256>}, {pipeline_mode = #tpu.pipeline_mode<synchronous>, transform_indices = @transform_3, window_bounds = array<i64: 256, 128>}, {pipeline_mode = #tpu.pipeline_mode<synchronous>, transform_indices = @transform_4, window_bounds = array<i64: 1, 128>}, {transform_indices = @transform_5, window_bounds = array<i64: 128, 128>}]} {
    %c0 = arith.constant 0 : index
    %c0_0 = arith.constant 0 : index
    %0 = vector.load %arg1[%c0, %c0_0] : memref<128x896xbf16, #tpu.memory_space<vmem>>, vector<128x896xbf16>
    %c0_1 = arith.constant 0 : index
    %c0_2 = arith.constant 0 : index
    %1 = vector.load %arg2[%c0_1, %c0_2] : memref<896x256xbf16, #tpu.memory_space<vmem>>, vector<896x256xbf16>
    %cst = arith.constant dense<0.000000e+00> : vector<128x256xf32>
    %2 = tpu.matmul %0, %1, %cst {dimension_numbers = #tpu.dot_dimension_numbers<[1], [0], [0], [1], [0, 0, 1, 1], [], []>} : vector<128x896xbf16>, vector<896x256xbf16>, vector<128x256xf32> -> vector<128x256xf32>
    %c0_3 = arith.constant 0 : index
    %c0_4 = arith.constant 0 : index
    %3 = vector.load %arg3[%c0_3, %c0_4] : memref<1x256xf32, #tpu.memory_space<vmem>>, vector<1x256xf32>
    %4 = vector.broadcast %3 : vector<1x256xf32> to vector<128x256xf32>
    %5 = arith.addf %2, %4 : vector<128x256xf32>
    %cst_5 = arith.constant 0.000000e+00 : f32
    %6 = vector.broadcast %cst_5 : f32 to vector<128x256xf32>
    %7 = arith.maximumf %5, %6 : vector<128x256xf32>
    %8 = arith.truncf %7 : vector<128x256xf32> to vector<128x256xbf16>
    %c0_6 = arith.constant 0 : index
    %c0_7 = arith.constant 0 : index
    %9 = vector.load %arg4[%c0_6, %c0_7] : memref<256x128xbf16, #tpu.memory_space<vmem>>, vector<256x128xbf16>
    %cst_8 = arith.constant dense<0.000000e+00> : vector<128x128xf32>
    %10 = tpu.matmul %8, %9, %cst_8 {dimension_numbers = #tpu.dot_dimension_numbers<[1], [0], [0], [1], [0, 0, 1, 1], [], []>} : vector<128x256xbf16>, vector<256x128xbf16>, vector<128x128xf32> -> vector<128x128xf32>
    %c0_9 = arith.constant 0 : index
    %c0_10 = arith.constant 0 : index
    %11 = vector.load %arg5[%c0_9, %c0_10] : memref<1x128xf32, #tpu.memory_space<vmem>>, vector<1x128xf32>
    %12 = vector.broadcast %11 : vector<1x128xf32> to vector<128x128xf32>
    %13 = arith.addf %10, %12 : vector<128x128xf32>
    %c0_11 = arith.constant 0 : index
    %c0_12 = arith.constant 0 : index
    %14 = vector.load %arg6[%c0_11, %c0_12] : memref<128x128xf32, #tpu.memory_space<vmem>>, vector<128x128xf32>
    tpu.vector_store %arg6[%c0_11, %c0_12], %13 {strides = array<i32>} : memref<128x128xf32, #tpu.memory_space<vmem>>, vector<128x128xf32>,
    return
  }
  func.func @transform_0(%arg0: i32) -> (i32, i32) {
    %c0_i32 = arith.constant 0 : i32
    %c0_i32_0 = arith.constant 0 : i32
    return %arg0, %c0_i32 : i32, i32
  }
  func.func @transform_1(%arg0: i32) -> (i32, i32) {
    %c0_i32 = arith.constant 0 : i32
    %c0_i32_0 = arith.constant 0 : i32
    %c0_i32_1 = arith.constant 0 : i32
    return %c0_i32, %c0_i32_0 : i32, i32
  }
  func.func @transform_2(%arg0: i32) -> (i32, i32) {
    %c0_i32 = arith.constant 0 : i32
    %c0_i32_0 = arith.constant 0 : i32
    %c0_i32_1 = arith.constant 0 : i32
    return %c0_i32, %c0_i32_0 : i32, i32
  }
  func.func @transform_3(%arg0: i32) -> (i32, i32) {
    %c0_i32 = arith.constant 0 : i32
    %c0_i32_0 = arith.constant 0 : i32
    %c0_i32_1 = arith.constant 0 : i32
    return %c0_i32, %c0_i32_0 : i32, i32
  }
  func.func @transform_4(%arg0: i32) -> (i32, i32) {
    %c0_i32 = arith.constant 0 : i32
    %c0_i32_0 = arith.constant 0 : i32
    %c0_i32_1 = arith.constant 0 : i32
    return %c0_i32, %c0_i32_0 : i32, i32
  }
  func.func @transform_5(%arg0: i32) -> (i32, i32) {
    %c0_i32 = arith.constant 0 : i32
    %c0_i32_0 = arith.constant 0 : i32
    return %arg0, %c0_i32 : i32, i32
  }
}

</mosaic_0001>

<bundles_post_ra>
// kernel: mlp_forward.1
= control target key start
LH: loop header
LB: loop body
LE: loop exit
PB: predicated region body
PF: predicated region fallthrough
CT: control target
= control target key end

     0   :  { %s3190_s1 = inlined_call_operand.vmem [shape: bf16[896,256], index: 1, kind: input, shape index: {}]   ;;  %s3191_s0 = inlined_call_operand.vmem [shape: bf16[128,896], index: 0, kind: input, shape index: {}]   ;;  %s3192_s3 = inlined_call_operand.vmem [shape: bf16[256,128], index: 3, kind: input, shape index: {}]   ;;  %s3193_s2 = inlined_call_operand.vmem [shape: f32[1,256], index: 2, kind: input, shape index: {}]   ;;  %s3194_s4 = inlined_call_operand.vmem [shape: f32[1,128], index: 4, kind: input, shape index: {}]   ;;  %s3195_s5 = inlined_call_operand.vmem [shape: f32[128,128], index: 5, kind: output, shape index: {}]  }
   0x1   :  { %v2091_v0 = vld [vmem:[%s3190_s1 + $0x74] ss:$8 sps:$4 sm:$0xff]   ;;  %v2095_v2 = vld [vmem:[%s3190_s1 + $0x70] ss:$8 sps:$4 sm:$0xff]   ;;  %v2097_v4 = vld [vmem:[%s3190_s1 + $0x64] ss:$8 sps:$4 sm:$0xff]  }
   0x2   :  { %v2093_v1 = vld [vmem:[%s3190_s1 + $0x174] ss:$8 sps:$4 sm:$0xff]   ;;  %1057 = vmatprep.subr.bf16.mxu0 %v2091_v0  ;;  %v2096_v3 = vld [vmem:[%s3190_s1 + $0x170] ss:$8 sps:$4 sm:$0xff]   ;;  %v2099_v5 = vld [vmem:[%s3190_s1 + $0x164] ss:$8 sps:$4 sm:$0xff]  }
   0x3   :  { %1170 = vmatprep.subr.bf16.mxu1 %v2093_v1  ;;  %1058 = vmatpush1.bf16.msra.mxu0 %v2095_v2  ;;  %v2101_v6 = vld [vmem:[%s3190_s1 + $0x60] ss:$8 sps:$4 sm:$0xff]   ;;  %v2103_v8 = vld [vmem:[%s3190_s1 + $0x54] ss:$8 sps:$4 sm:$0xff]   ;;  %v2107_v10 = vld [vmem:[%s3190_s1 + $0x50] ss:$8 sps:$4 sm:$0xff]  }
   0x4   :  { %1171 = vmatpush1.bf16.msra.mxu1 %v2096_v3  ;;  %1059 = vmatprep.subr.bf16.mxu0 %v2097_v4  ;;  %v2102_v7 = vld [vmem:[%s3190_s1 + $0x160] ss:$8 sps:$4 sm:$0xff]   ;;  %v2105_v9 = vld [vmem:[%s3190_s1 + $0x154] ss:$8 sps:$4 sm:$0xff]   ;;  %v2108_v11 = vld [vmem:[%s3190_s1 + $0x150] ss:$8 sps:$4 sm:$0xff]  }
   0x5   :  { %1172 = vmatprep.subr.bf16.mxu1 %v2099_v5  ;;  %v2109_v12 = vld [vmem:[%s3190_s1 + $0x44] ss:$8 sps:$4 sm:$0xff]   ;;  %v2113_v14 = vld [vmem:[%s3190_s1 + $0x40] ss:$8 sps:$4 sm:$0xff]   ;;  %v2115_v16 = vld [vmem:[%s3190_s1 + $0x34] ss:$8 sps:$4 sm:$0xff]  }
   0x6   :  { %v2111_v13 = vld [vmem:[%s3190_s1 + $0x144] ss:$8 sps:$4 sm:$0xff]   ;;  %v2114_v15 = vld [vmem:[%s3190_s1 + $0x140] ss:$8 sps:$4 sm:$0xff]   ;;  %v2117_v17 = vld [vmem:[%s3190_s1 + $0x134] ss:$8 sps:$4 sm:$0xff]  }
   0x7   :  { %1060 = vmatpush1.bf16.msra.mxu0 %v2101_v6  ;;  %v2119_v18 = vld [vmem:[%s3190_s1 + $0x30] ss:$8 sps:$4 sm:$0xff]   ;;  %v2121_v20 = vld [vmem:[%s3190_s1 + $0x24] ss:$8 sps:$4 sm:$0xff]   ;;  %v2125_v22 = vld [vmem:[%s3190_s1 + $0x20] ss:$8 sps:$4 sm:$0xff]  }
   0x8   :  { %1173 = vmatpush1.bf16.msra.mxu1 %v2102_v7  ;;  %1061 = vmatprep.subr.bf16.mxu0 %v2103_v8  ;;  %v2120_v19 = vld [vmem:[%s3190_s1 + $0x130] ss:$8 sps:$4 sm:$0xff]   ;;  %v2123_v21 = vld [vmem:[%s3190_s1 + $0x124] ss:$8 sps:$4 sm:$0xff]   ;;  %v2126_v23 = vld [vmem:[%s3190_s1 + $0x120] ss:$8 sps:$4 sm:$0xff]  }
   0x9   :  { %1174 = vmatprep.subr.bf16.mxu1 %v2105_v9  ;;  %v2127_v24 = vld [vmem:[%s3190_s1 + $0x14] ss:$8 sps:$4 sm:$0xff]   ;;  %v2131_v26 = vld [vmem:[%s3190_s1 + $0x10] ss:$8 sps:$4 sm:$0xff]   ;;  %v2133_v28 = vld [vmem:[%s3190_s1 + $0x4] ss:$8 sps:$4 sm:$0xff]  }
   0xa   :  { %v2129_v25 = vld [vmem:[%s3190_s1 + $0x114] ss:$8 sps:$4 sm:$0xff]   ;;  %v2132_v27 = vld [vmem:[%s3190_s1 + $0x110] ss:$8 sps:$4 sm:$0xff]   ;;  %v2135_v29 = vld [vmem:[%s3190_s1 + $0x104] ss:$8 sps:$4 sm:$0xff]  }
   0xb   :  { %1062 = vmatpush1.bf16.msra.mxu0 %v2107_v10  ;;  %v2137_v30 = vld [vmem:[%s3190_s1] ss:$8 sps:$4 sm:$0xff]   ;;  %v2139_v32 = vld [vmem:[%s3190_s1 + $0xf4] ss:$8 sps:$4 sm:$0xff]   ;;  %v2143_v34 = vld [vmem:[%s3190_s1 + $0xf0] ss:$8 sps:$4 sm:$0xff]  }
   0xc   :  { %1175 = vmatpush1.bf16.msra.mxu1 %v2108_v11  ;;  %1063 = vmatprep.subr.bf16.mxu0 %v2109_v12  ;;  %v2138_v31 = vld [vmem:[%s3190_s1 + $0x100] ss:$8 sps:$4 sm:$0xff]   ;;  %v2141_v33 = vld [vmem:[%s3190_s1 + $0x1f4] ss:$8 sps:$4 sm:$0xff]   ;;  %v2144_v35 = vld [vmem:[%s3190_s1 + $0x1f0] ss:$8 sps:$4 sm:$0xff]  }
   0xd   :  { %1176 = vmatprep.subr.bf16.mxu1 %v2111_v13  ;;  %v2145_v36 = vld [vmem:[%s3190_s1 + $0xe4] ss:$8 sps:$4 sm:$0xff]   ;;  %v2149_v38 = vld [vmem:[%s3190_s1 + $0xe0] ss:$8 sps:$4 sm:$0xff]   ;;  %v2151_v40 = vld [vmem:[%s3190_s1 + $0xd4] ss:$8 sps:$4 sm:$0xff]  }
   0xe   :  { %v2147_v37 = vld [vmem:[%s3190_s1 + $0x1e4] ss:$8 sps:$4 sm:$0xff]   ;;  %v2150_v39 = vld [vmem:[%s3190_s1 + $0x1e0] ss:$8 sps:$4 sm:$0xff]   ;;  %v2153_v41 = vld [vmem:[%s3190_s1 + $0x1d4] ss:$8 sps:$4 sm:$0xff]  }
   0xf   :  { %1064 = vmatpush1.bf16.msra.mxu0 %v2113_v14  ;;  %v2155_v42 = vld [vmem:[%s3190_s1 + $0xd0] ss:$8 sps:$4 sm:$0xff]   ;;  %v2157_v44 = vld [vmem:[%s3190_s1 + $0xc4] ss:$8 sps:$4 sm:$0xff]   ;;  %v2161_v46 = vld [vmem:[%s3190_s1 + $0xc0] ss:$8 sps:$4 sm:$0xff]  }
  0x10   :  { %1177 = vmatpush1.bf16.msra.mxu1 %v2114_v15  ;;  %1065 = vmatprep.subr.bf16.mxu0 %v2115_v16  ;;  %v2156_v43 = vld [vmem:[%s3190_s1 + $0x1d0] ss:$8 sps:$4 sm:$0xff]   ;;  %v2159_v45 = vld [vmem:[%s3190_s1 + $0x1c4] ss:$8 sps:$4 sm:$0xff]   ;;  %v2162_v47 = vld [vmem:[%s3190_s1 + $0x1c0] ss:$8 sps:$4 sm:$0xff]  }
  0x11   :  { %1178 = vmatprep.subr.bf16.mxu1 %v2117_v17  ;;  %v2163_v48 = vld [vmem:[%s3190_s1 + $0xb4] ss:$8 sps:$4 sm:$0xff]   ;;  %v2189_v49 = vld [vmem:[%s3191_s0 + $0x4] ss:$28 sps:$4 sm:$0xff]   ;;  %v2192_v51 = vld [vmem:[%s3191_s0 + $0xc] ss:$28 sps:$4 sm:$0xff]  }
  0x12   :  { %v2165_v50 = vld [vmem:[%s3190_s1 + $0x1b4] ss:$8 sps:$4 sm:$0xff]   ;;  %1089 = vmatprep.mubr.bf16.mxu0 %v2189_v49  ;;  %v2167_v52 = vld [vmem:[%s3190_s1 + $0xb0] ss:$8 sps:$4 sm:$0xff]   ;;  %1202 = vmatprep.mubr.bf16.mxu1 %v2192_v51  ;;  %v2169_v54 = vld [vmem:[%s3190_s1 + $0xa4] ss:$8 sps:$4 sm:$0xff]  }
  0x13   :  { %1066 = vmatpush1.bf16.msra.mxu0 %v2119_v18  ;;  %v2168_v53 = vld [vmem:[%s3190_s1 + $0x1b0] ss:$8 sps:$4 sm:$0xff]   ;;  %v2171_v55 = vld [vmem:[%s3190_s1 + $0x1a4] ss:$8 sps:$4 sm:$0xff]   ;;  %v2173_v56 = vld [vmem:[%s3190_s1 + $0xa0] ss:$8 sps:$4 sm:$0xff]  }
  0x14   :  { %1179 = vmatpush1.bf16.msra.mxu1 %v2120_v19  ;;  %1067 = vmatprep.subr.bf16.mxu0 %v2121_v20  ;;  %v2174_v57 = vld [vmem:[%s3190_s1 + $0x1a0] ss:$8 sps:$4 sm:$0xff]   ;;  %v2175_v58 = vld [vmem:[%s3190_s1 + $0x94] ss:$8 sps:$4 sm:$0xff]   ;;  %v2179_v60 = vld [vmem:[%s3190_s1 + $0x90] ss:$8 sps:$4 sm:$0xff]  }
  0x15   :  { %1180 = vmatprep.subr.bf16.mxu1 %v2123_v21  ;;  %v2177_v59 = vld [vmem:[%s3190_s1 + $0x194] ss:$8 sps:$4 sm:$0xff]   ;;  %v2180_v61 = vld [vmem:[%s3190_s1 + $0x190] ss:$8 sps:$4 sm:$0xff]   ;;  %v2181_v62 = vld [vmem:[%s3190_s1 + $0x84] ss:$8 sps:$4 sm:$0xff]  }
  0x16   :  { %v2183_v63 = vld [vmem:[%s3190_s1 + $0x184] ss:$8 sps:$4 sm:$0xff]   ;;  %v2185_v0 = vld [vmem:[%s3190_s1 + $0x80] ss:$8 sps:$4 sm:$0xff]   ;;  %v2195_v2 = vld [vmem:[%s3190_s1 + $0x274] ss:$8 sps:$4 sm:$0xff]  }
  0x17   :  { %1068 = vmatpush1.bf16.msra.mxu0 %v2125_v22  ;;  %v2186_v1 = vld [vmem:[%s3190_s1 + $0x180] ss:$8 sps:$4 sm:$0xff]   ;;  %v2193_v5 = vld [vmem:[%s3190_s1 + $0x270] ss:$8 sps:$4 sm:$0xff]   ;;  %v2198_v6 = vld [vmem:[%s3190_s1 + $0x264] ss:$8 sps:$4 sm:$0xff]  }
  0x18   :  { %1181 = vmatpush1.bf16.msra.mxu1 %v2126_v23  ;;  %1069 = vmatprep.subr.bf16.mxu0 %v2127_v24  ;;  %v2187_v3 = vld [vmem:[%s3191_s0] ss:$28 sps:$4 sm:$0xff]   ;;  %v2190_v4 = vld [vmem:[%s3191_s0 + $0x8] ss:$28 sps:$4 sm:$0xff]   ;;  %v2203_v11 = vld [vmem:[%s3191_s0 + $0x38] ss:$28 sps:$4 sm:$0xff]  }
  0x19   :  { %1182 = vmatprep.subr.bf16.mxu1 %v2129_v25  ;;  %v2199_v7 = vld [vmem:[%s3191_s0 + $0x3c] ss:$28 sps:$4 sm:$0xff]   ;;  %v2201_v8 = vld [vmem:[%s3191_s0 + $0x44] ss:$28 sps:$4 sm:$0xff]   ;;  %v2211_v15 = vld [vmem:[%s3191_s0 + $0x74] ss:$28 sps:$4 sm:$0xff]  }
  0x1a   :  { %v2196_v9 = vld [vmem:[%s3190_s1 + $0x260] ss:$8 sps:$4 sm:$0xff]   ;;  %v2207_v10 = vld [vmem:[%s3190_s1 + $0x254] ss:$8 sps:$4 sm:$0xff]   ;;  %v2205_v13 = vld [vmem:[%s3190_s1 + $0x250] ss:$8 sps:$4 sm:$0xff]  }
  0x1b   :  { %1070 = vmatpush1.bf16.msra.mxu0 %v2131_v26  ;;  %v2204_v12 = vld [vmem:[%s3191_s0 + $0x40] ss:$28 sps:$4 sm:$0xff]   ;;  %v2210_v14 = vld [vmem:[%s3190_s1 + $0x244] ss:$8 sps:$4 sm:$0xff]   ;;  %v2216_v20 = vld [vmem:[%s3191_s0 + $0x78] ss:$28 sps:$4 sm:$0xff]  }
  0x1c   :  { %1183 = vmatpush1.bf16.msra.mxu1 %v2132_v27  ;;  %1071 = vmatprep.subr.bf16.mxu0 %v2133_v28  ;;  %v2213_v16 = vld [vmem:[%s3191_s0 + $0x7c] ss:$28 sps:$4 sm:$0xff]   ;;  %v2208_v17 = vld [vmem:[%s3190_s1 + $0x240] ss:$8 sps:$4 sm:$0xff]   ;;  %v2215_v19 = vld [vmem:[%s3191_s0 + $0x70] ss:$28 sps:$4 sm:$0xff]  }
  0x1d   :  { %1184 = vmatprep.subr.bf16.mxu1 %v2135_v29  ;;  %v2219_v18 = vld [vmem:[%s3190_s1 + $0x234] ss:$8 sps:$4 sm:$0xff]   ;;  %v2217_v21 = vld [vmem:[%s3190_s1 + $0x230] ss:$8 sps:$4 sm:$0xff]   ;;  %v2222_v22 = vld [vmem:[%s3190_s1 + $0x224] ss:$8 sps:$4 sm:$0xff]  }
  0x1e   :  { %v2223_v23 = vld [vmem:[%s3191_s0 + $0xac] ss:$28 sps:$4 sm:$0xff]   ;;  %v2225_v24 = vld [vmem:[%s3191_s0 + $0xb4] ss:$28 sps:$4 sm:$0xff]  }
  0x1f   :  { %1072 = vmatpush1.bf16.msra.mxu0 %v2137_v30  ;;  %v2220_v25 = vld [vmem:[%s3190_s1 + $0x220] ss:$8 sps:$4 sm:$0xff]   ;;  %v2231_v26 = vld [vmem:[%s3190_s1 + $0x214] ss:$8 sps:$4 sm:$0xff]   ;;  %v2228_v28 = vld [vmem:[%s3191_s0 + $0xb0] ss:$28 sps:$4 sm:$0xff]  }
  0x20   :  { %1185 = vmatpush1.bf16.msra.mxu1 %v2138_v31  ;;  %1073 = vmatprep.subr.bf16.mxu0 %v2139_v32  ;;  %v2227_v27 = vld [vmem:[%s3191_s0 + $0xa8] ss:$28 sps:$4 sm:$0xff]   ;;  %v2229_v29 = vld [vmem:[%s3190_s1 + $0x210] ss:$8 sps:$4 sm:$0xff]  }
  0x21   :  { %1186 = vmatprep.subr.bf16.mxu1 %v2141_v33  ;;  %v2234_v30 = vld [vmem:[%s3190_s1 + $0x204] ss:$8 sps:$4 sm:$0xff]   ;;  %v2232_v33 = vld [vmem:[%s3190_s1 + $0x200] ss:$8 sps:$4 sm:$0xff]  }
  0x22   :  { %v2235_v31 = vld [vmem:[%s3191_s0 + $0xe4] ss:$28 sps:$4 sm:$0xff]   ;;  %v2237_v32 = vld [vmem:[%s3191_s0 + $0xec] ss:$28 sps:$4 sm:$0xff]  }
  0x23   :  { %1074 = vmatpush2.bf16.msra.mxu0 %v2143_v34  ;;  %v2243_v34 = vld [vmem:[%s3190_s1 + $0x2f4] ss:$8 sps:$4 sm:$0xff]   ;;  %v2256_v49 = vld [vmem:[%s3190_s1 + $0x2c0] ss:$8 sps:$4 sm:$0xff]   ;;  %v2263_v51 = vld [vmem:[%s3191_s0 + $0x150] ss:$28 sps:$4 sm:$0xff]  }
  0x24   :  { %1187 = vmatpush2.bf16.msra.mxu1 %v2144_v35  ;;  %1075 = vmatprep.subr.bf16.mxu0 %v2145_v36  ;;  %v2239_v35 = vld [vmem:[%s3191_s0 + $0xe0] ss:$28 sps:$4 sm:$0xff]   ;;  %v2240_v36 = vld [vmem:[%s3191_s0 + $0xe8] ss:$28 sps:$4 sm:$0xff]  }
  0x25   :  { %1188 = vmatprep.subr.bf16.mxu1 %v2147_v37  ;;  %v2241_v37 = vld [vmem:[%s3190_s1 + $0x2f0] ss:$8 sps:$4 sm:$0xff]  }
  0x27   :  { %1076 = vmatpush2.bf16.msra.mxu0 %v2149_v38  ;;  %v2246_v38 = vld [vmem:[%s3190_s1 + $0x2e4] ss:$8 sps:$4 sm:$0xff]  }
  0x28   :  { %1189 = vmatpush2.bf16.msra.mxu1 %v2150_v39  ;;  %1077 = vmatprep.subr.bf16.mxu0 %v2151_v40  ;;  %v2247_v39 = vld [vmem:[%s3191_s0 + $0x11c] ss:$28 sps:$4 sm:$0xff]   ;;  %v2249_v40 = vld [vmem:[%s3191_s0 + $0x124] ss:$28 sps:$4 sm:$0xff]  }
  0x29   :  { %1190 = vmatprep.subr.bf16.mxu1 %v2153_v41  ;;  %v2244_v41 = vld [vmem:[%s3190_s1 + $0x2e0] ss:$8 sps:$4 sm:$0xff]  }
  0x2b   :  { %1078 = vmatpush2.bf16.msra.mxu0 %v2155_v42  ;;  %v2255_v42 = vld [vmem:[%s3190_s1 + $0x2d4] ss:$8 sps:$4 sm:$0xff]  }
  0x2c   :  { %1191 = vmatpush2.bf16.msra.mxu1 %v2156_v43  ;;  %1079 = vmatprep.subr.bf16.mxu0 %v2157_v44  ;;  %v2251_v43 = vld [vmem:[%s3191_s0 + $0x118] ss:$28 sps:$4 sm:$0xff]   ;;  %v2252_v44 = vld [vmem:[%s3191_s0 + $0x120] ss:$28 sps:$4 sm:$0xff]  }
  0x2d   :  { %1192 = vmatprep.subr.bf16.mxu1 %v2159_v45  ;;  %v2253_v45 = vld [vmem:[%s3190_s1 + $0x2d0] ss:$8 sps:$4 sm:$0xff]  }
  0x2f   :  { %1080 = vmatpush2.bf16.msra.mxu0 %v2161_v46  ;;  %v2258_v46 = vld [vmem:[%s3190_s1 + $0x2c4] ss:$8 sps:$4 sm:$0xff]  }
  0x30   :  { %1193 = vmatpush2.bf16.msra.mxu1 %v2162_v47  ;;  %1081 = vmatprep.subr.bf16.mxu0 %v2163_v48  ;;  %v2259_v47 = vld [vmem:[%s3191_s0 + $0x154] ss:$28 sps:$4 sm:$0xff]   ;;  %v2261_v48 = vld [vmem:[%s3191_s0 + $0x15c] ss:$28 sps:$4 sm:$0xff]  }
  0x31   :  { %1194 = vmatprep.subr.bf16.mxu1 %v2165_v50  ;;  %v2267_v50 = vld [vmem:[%s3190_s1 + $0x2b4] ss:$8 sps:$4 sm:$0xff]  }
  0x33   :  { %1082 = vmatpush2.bf16.msra.mxu0 %v2167_v52  ;;  %v2264_v52 = vld [vmem:[%s3191_s0 + $0x158] ss:$28 sps:$4 sm:$0xff]  }
  0x34   :  { %1195 = vmatpush2.bf16.msra.mxu1 %v2168_v53  ;;  %1083 = vmatprep.subr.bf16.mxu0 %v2169_v54  ;;  %v2265_v53 = vld [vmem:[%s3190_s1 + $0x2b0] ss:$8 sps:$4 sm:$0xff]   ;;  %v2270_v54 = vld [vmem:[%s3190_s1 + $0x2a4] ss:$8 sps:$4 sm:$0xff]  }
  0x35   :  { %1196 = vmatprep.subr.bf16.mxu1 %v2171_v55  ;;  %v2271_v55 = vld [vmem:[%s3191_s0 + $0x18c] ss:$28 sps:$4 sm:$0xff]  }
  0x37   :  { %1084 = vmatpush2.bf16.msra.mxu0 %v2173_v56  ;;  %v2273_v56 = vld [vmem:[%s3191_s0 + $0x194] ss:$28 sps:$4 sm:$0xff]  }
  0x38   :  { %1197 = vmatpush2.bf16.msra.mxu1 %v2174_v57  ;;  %1085 = vmatprep.subr.bf16.mxu0 %v2175_v58  ;;  %v2268_v57 = vld [vmem:[%s3190_s1 + $0x2a0] ss:$8 sps:$4 sm:$0xff]   ;;  %v2279_v58 = vld [vmem:[%s3190_s1 + $0x294] ss:$8 sps:$4 sm:$0xff]  }
  0x39   :  { %1198 = vmatprep.subr.bf16.mxu1 %v2177_v59  ;;  %v2275_v59 = vld [vmem:[%s3191_s0 + $0x188] ss:$28 sps:$4 sm:$0xff]  }
  0x3b   :  { %1086 = vmatpush2.bf16.msra.mxu0 %v2179_v60  ;;  %v2276_v60 = vld [vmem:[%s3191_s0 + $0x190] ss:$28 sps:$4 sm:$0xff]  }
  0x3c   :  { %1199 = vmatpush2.bf16.msra.mxu1 %v2180_v61  ;;  %1087 = vmatprep.subr.bf16.mxu0 %v2181_v62  ;;  %v2277_v61 = vld [vmem:[%s3190_s1 + $0x290] ss:$8 sps:$4 sm:$0xff]   ;;  %v2282_v62 = vld [vmem:[%s3190_s1 + $0x284] ss:$8 sps:$4 sm:$0xff]  }
  0x3d   :  { %1200 = vmatprep.subr.bf16.mxu1 %v2183_v63  ;;  %v2285_v63 = vld [vmem:[%s3191_s0 + $0x14] ss:$28 sps:$4 sm:$0xff]  }
  0x3f   :  { %1088 = vmatpush2.bf16.msra.mxu0 %v2185_v0  ;;  %v2288_v0 = vld [vmem:[%s3191_s0 + $0xf4] ss:$28 sps:$4 sm:$0xff]  }
  0x40   :  { %1201 = vmatpush2.bf16.msra.mxu1 %v2186_v1  ;;  %1283 = vmatprep.subr.bf16.mxu0 %v2195_v2  ;;  %v2280_v1 = vld [vmem:[%s3190_s1 + $0x280] ss:$8 sps:$4 sm:$0xff]  }
  0x41   :  { %2058 = vmatprep.subr.bf16.mxu1 %v2195_v2  ;;  %v2291_v2 = vld [vmem:[%s3190_s1 + $0x374] ss:$8 sps:$4 sm:$0xff]  }
  0x42   :  { %1090 = vmatmul.mubr.bf16.vlgmr.msra.gmra.mxu0 %v2187_v3  ;;  %v2283_v3 = vld [vmem:[%s3191_s0 + $0x10] ss:$28 sps:$4 sm:$0xff]  }
  0x43   :  { %1203 = vmatmul.mubr.bf16.vlgmr.msra.gmra.mxu1 %v2190_v4  ;;  %1284 = vmatpush1.bf16.msra.mxu0 %v2193_v5  ;;  %v2286_v4 = vld [vmem:[%s3191_s0 + $0xf0] ss:$28 sps:$4 sm:$0xff]  }
  0x44   :  { %2074 = vmatpush1.bf16.msra.mxu1 %v2193_v5  ;;  %1285 = vmatprep.subr.bf16.mxu0 %v2198_v6  ;;  %v2289_v5 = vld [vmem:[%s3190_s1 + $0x370] ss:$8 sps:$4 sm:$0xff]  }
  0x45   :  { %2059 = vmatprep.subr.bf16.mxu1 %v2198_v6  ;;  %1099 = vmatprep.mubr.bf16.mxu0 %v2199_v7  ;;  %v2295_v6 = vld [vmem:[%s3191_s0 + $0x4c] ss:$28 sps:$4 sm:$0xff]  }
  0x46   :  { %1212 = vmatprep.mubr.bf16.mxu1 %v2201_v8  ;;  %v2294_v7 = vld [vmem:[%s3190_s1 + $0x364] ss:$8 sps:$4 sm:$0xff]  }
  0x47   :  { %1286 = vmatpush1.bf16.msra.mxu0 %v2196_v9  ;;  %v2297_v8 = vld [vmem:[%s3191_s0 + $0x12c] ss:$28 sps:$4 sm:$0xff]  }
  0x48   :  { %2075 = vmatpush1.bf16.msra.mxu1 %v2196_v9  ;;  %1287 = vmatprep.subr.bf16.mxu0 %v2207_v10  ;;  %v2292_v9 = vld [vmem:[%s3190_s1 + $0x360] ss:$8 sps:$4 sm:$0xff]  }
  0x49   :  { %2060 = vmatprep.subr.bf16.mxu1 %v2207_v10  ;;  %v2303_v10 = vld [vmem:[%s3190_s1 + $0x354] ss:$8 sps:$4 sm:$0xff]  }
  0x4a   :  { %1100 = vmatmul.mubr.bf16.gmra.mxu0 %v2203_v11  ;;  %v2299_v11 = vld [vmem:[%s3191_s0 + $0x48] ss:$28 sps:$4 sm:$0xff]  }
  0x4b   :  { %1213 = vmatmul.mubr.bf16.gmra.mxu1 %v2204_v12  ;;  %1288 = vmatpush1.bf16.msra.mxu0 %v2205_v13  ;;  %v2300_v12 = vld [vmem:[%s3191_s0 + $0x128] ss:$28 sps:$4 sm:$0xff]  }
  0x4c   :  { %2076 = vmatpush1.bf16.msra.mxu1 %v2205_v13  ;;  %1289 = vmatprep.subr.bf16.mxu0 %v2210_v14  ;;  %v2301_v13 = vld [vmem:[%s3190_s1 + $0x350] ss:$8 sps:$4 sm:$0xff]  }
  0x4d   :  { %2061 = vmatprep.subr.bf16.mxu1 %v2210_v14  ;;  %1109 = vmatprep.mubr.bf16.mxu0 %v2211_v15  ;;  %v2307_v14 = vld [vmem:[%s3191_s0 + $0x84] ss:$28 sps:$4 sm:$0xff]  }
  0x4e   :  { %1222 = vmatprep.mubr.bf16.mxu1 %v2213_v16  ;;  %v2306_v15 = vld [vmem:[%s3190_s1 + $0x344] ss:$8 sps:$4 sm:$0xff]  }
  0x4f   :  { %1290 = vmatpush1.bf16.msra.mxu0 %v2208_v17  ;;  %v2309_v16 = vld [vmem:[%s3191_s0 + $0x164] ss:$28 sps:$4 sm:$0xff]  }
  0x50   :  { %2077 = vmatpush1.bf16.msra.mxu1 %v2208_v17  ;;  %1291 = vmatprep.subr.bf16.mxu0 %v2219_v18  ;;  %v2304_v17 = vld [vmem:[%s3190_s1 + $0x340] ss:$8 sps:$4 sm:$0xff]  }
  0x51   :  { %2062 = vmatprep.subr.bf16.mxu1 %v2219_v18  ;;  %v2315_v18 = vld [vmem:[%s3190_s1 + $0x334] ss:$8 sps:$4 sm:$0xff]  }
  0x52   :  { %1110 = vmatmul.mubr.bf16.gmra.mxu0 %v2215_v19  ;;  %v2311_v19 = vld [vmem:[%s3191_s0 + $0x80] ss:$28 sps:$4 sm:$0xff]  }
  0x53   :  { %1223 = vmatmul.mubr.bf16.gmra.mxu1 %v2216_v20  ;;  %1292 = vmatpush1.bf16.msra.mxu0 %v2217_v21  ;;  %v2312_v20 = vld [vmem:[%s3191_s0 + $0x160] ss:$28 sps:$4 sm:$0xff]  }
  0x54   :  { %2078 = vmatpush1.bf16.msra.mxu1 %v2217_v21  ;;  %1293 = vmatprep.subr.bf16.mxu0 %v2222_v22  ;;  %v2313_v21 = vld [vmem:[%s3190_s1 + $0x330] ss:$8 sps:$4 sm:$0xff]  }
  0x55   :  { %2063 = vmatprep.subr.bf16.mxu1 %v2222_v22  ;;  %1119 = vmatprep.mubr.bf16.mxu0 %v2223_v23  ;;  %v2319_v22 = vld [vmem:[%s3191_s0 + $0xbc] ss:$28 sps:$4 sm:$0xff]   ;;  %v2318_v23 = vld [vmem:[%s3190_s1 + $0x324] ss:$8 sps:$4 sm:$0xff]  }
  0x56   :  { %1232 = vmatprep.mubr.bf16.mxu1 %v2225_v24  ;;  %v2321_v24 = vld [vmem:[%s3191_s0 + $0x19c] ss:$28 sps:$4 sm:$0xff]  }
  0x57   :  { %1294 = vmatpush1.bf16.msra.mxu0 %v2220_v25 }
  0x58   :  { %2079 = vmatpush1.bf16.msra.mxu1 %v2220_v25  ;;  %1295 = vmatprep.subr.bf16.mxu0 %v2231_v26  ;;  %v2316_v25 = vld [vmem:[%s3190_s1 + $0x320] ss:$8 sps:$4 sm:$0xff]  }
  0x59   :  { %2064 = vmatprep.subr.bf16.mxu1 %v2231_v26  ;;  %v2327_v26 = vld [vmem:[%s3190_s1 + $0x314] ss:$8 sps:$4 sm:$0xff]  }
  0x5a   :  { %1120 = vmatmul.mubr.bf16.gmra.mxu0 %v2227_v27  ;;  %v2323_v27 = vld [vmem:[%s3191_s0 + $0xb8] ss:$28 sps:$4 sm:$0xff]  }
  0x5b   :  { %1233 = vmatmul.mubr.bf16.gmra.mxu1 %v2228_v28  ;;  %1296 = vmatpush1.bf16.msra.mxu0 %v2229_v29  ;;  %v2324_v28 = vld [vmem:[%s3191_s0 + $0x198] ss:$28 sps:$4 sm:$0xff]  }
  0x5c   :  { %2080 = vmatpush1.bf16.msra.mxu1 %v2229_v29  ;;  %1297 = vmatprep.subr.bf16.mxu0 %v2234_v30  ;;  %v2325_v29 = vld [vmem:[%s3190_s1 + $0x310] ss:$8 sps:$4 sm:$0xff]  }
  0x5d   :  { %2065 = vmatprep.subr.bf16.mxu1 %v2234_v30  ;;  %1129 = vmatprep.mubr.bf16.mxu0 %v2235_v31  ;;  %v2330_v30 = vld [vmem:[%s3190_s1 + $0x304] ss:$8 sps:$4 sm:$0xff]   ;;  %v2328_v31 = vld [vmem:[%s3190_s1 + $0x300] ss:$8 sps:$4 sm:$0xff]  }
  0x5e   :  { %1242 = vmatprep.mubr.bf16.mxu1 %v2237_v32  ;;  %v2355_v32 = vmov 0  }
  0x5f   :  { %1298 = vmatpush1.bf16.msra.mxu0 %v2232_v33 }
  0x60   :  { %2081 = vmatpush1.bf16.msra.mxu1 %v2232_v33  ;;  %1299 = vmatprep.subr.bf16.mxu0 %v2243_v34  ;;  %v2331_v33 = vld [vmem:[%s3191_s0 + $0x18] ss:$28 sps:$4 sm:$0xff]  }
  0x61   :  { %2066 = vmatprep.subr.bf16.mxu1 %v2243_v34  ;;  %v2332_v34 = vld [vmem:[%s3191_s0 + $0x50] ss:$28 sps:$4 sm:$0xff]  }
  0x62   :  { %1130 = vmatmul.mubr.bf16.gmra.mxu0 %v2239_v35  ;;  %v2333_v35 = vld [vmem:[%s3191_s0 + $0x88] ss:$28 sps:$4 sm:$0xff]  }
  0x63   :  { %1243 = vmatmul.mubr.bf16.gmra.mxu1 %v2240_v36  ;;  %1300 = vmatpush2.bf16.msra.mxu0 %v2241_v37  ;;  %v2334_v36 = vld [vmem:[%s3191_s0 + $0xc0] ss:$28 sps:$4 sm:$0xff]  }
  0x64   :  { %2082 = vmatpush2.bf16.msra.mxu1 %v2241_v37  ;;  %1301 = vmatprep.subr.bf16.mxu0 %v2246_v38  ;;  %v2335_v37 = vld [vmem:[%s3191_s0 + $0xf8] ss:$28 sps:$4 sm:$0xff]  }
  0x65   :  { %2067 = vmatprep.subr.bf16.mxu1 %v2246_v38  ;;  %1139 = vmatprep.mubr.bf16.mxu0 %v2247_v39  ;;  %v2336_v38 = vld [vmem:[%s3191_s0 + $0x130] ss:$28 sps:$4 sm:$0xff]   ;;  %v2337_v39 = vld [vmem:[%s3191_s0 + $0x168] ss:$28 sps:$4 sm:$0xff]  }
  0x66   :  { %1252 = vmatprep.mubr.bf16.mxu1 %v2249_v40  ;;  %v2339_v40 = vld [vmem:[%s3192_s3 + $0x78] sm:$0xff]  }
  0x67   :  { %1302 = vmatpush2.bf16.msra.mxu0 %v2244_v41 }
  0x68   :  { %2083 = vmatpush2.bf16.msra.mxu1 %v2244_v41  ;;  %1303 = vmatprep.subr.bf16.mxu0 %v2255_v42  ;;  %v2340_v41 = vld [vmem:[%s3192_s3 + $0x38] sm:$0xff]  }
  0x69   :  { %2068 = vmatprep.subr.bf16.mxu1 %v2255_v42  ;;  %v2341_v42 = vld [vmem:[%s3192_s3 + $0x70] sm:$0xff]  }
  0x6a   :  { %1140 = vmatmul.mubr.bf16.gmra.mxu0 %v2251_v43  ;;  %v2342_v43 = vld [vmem:[%s3192_s3 + $0x30] sm:$0xff]  }
  0x6b   :  { %1253 = vmatmul.mubr.bf16.gmra.mxu1 %v2252_v44  ;;  %1304 = vmatpush2.bf16.msra.mxu0 %v2253_v45  ;;  %v2338_v44 = vld [vmem:[%s3191_s0 + $0x1a0] ss:$28 sps:$4 sm:$0xff]  }
  0x6c   :  { %2084 = vmatpush2.bf16.msra.mxu1 %v2253_v45  ;;  %1305 = vmatprep.subr.bf16.mxu0 %v2258_v46  ;;  %v2343_v45 = vld [vmem:[%s3192_s3 + $0x68] sm:$0xff]  }
  0x6d   :  { %2069 = vmatprep.subr.bf16.mxu1 %v2258_v46  ;;  %1149 = vmatprep.mubr.bf16.mxu0 %v2259_v47  ;;  %v2344_v46 = vld [vmem:[%s3192_s3 + $0x28] sm:$0xff]   ;;  %v2345_v47 = vld [vmem:[%s3192_s3 + $0x60] sm:$0xff]  }
  0x6e   :  { %1262 = vmatprep.mubr.bf16.mxu1 %v2261_v48  ;;  %v2346_v48 = vld [vmem:[%s3192_s3 + $0x20] sm:$0xff]  }
  0x6f   :  { %1306 = vmatpush2.bf16.msra.mxu0 %v2256_v49 }
  0x70   :  { %2085 = vmatpush2.bf16.msra.mxu1 %v2256_v49  ;;  %1307 = vmatprep.subr.bf16.mxu0 %v2267_v50  ;;  %v2347_v49 = vld [vmem:[%s3192_s3 + $0x58] sm:$0xff]  }
  0x71   :  { %2070 = vmatprep.subr.bf16.mxu1 %v2267_v50  ;;  %v2348_v50 = vld [vmem:[%s3192_s3 + $0x18] sm:$0xff]  }
  0x72   :  { %1150 = vmatmul.mubr.bf16.gmra.mxu0 %v2263_v51  ;;  %v2349_v51 = vld [vmem:[%s3192_s3 + $0x50] sm:$0xff]  }
  0x73   :  { %1263 = vmatmul.mubr.bf16.gmra.mxu1 %v2264_v52  ;;  %1308 = vmatpush2.bf16.msra.mxu0 %v2265_v53  ;;  %v2350_v52 = vld [vmem:[%s3192_s3 + $0x10] sm:$0xff]  }
  0x74   :  { %2086 = vmatpush2.bf16.msra.mxu1 %v2265_v53  ;;  %1309 = vmatprep.subr.bf16.mxu0 %v2270_v54  ;;  %v2351_v53 = vld [vmem:[%s3192_s3 + $0x48] sm:$0xff]  }
  0x75   :  { %2071 = vmatprep.subr.bf16.mxu1 %v2270_v54  ;;  %1159 = vmatprep.mubr.bf16.mxu0 %v2271_v55  ;;  %v2352_v54 = vld [vmem:[%s3192_s3 + $0x8] sm:$0xff]   ;;  %v2353_v55 = vld [vmem:[%s3192_s3 + $0x40] sm:$0xff]  }
  0x76   :  { %1272 = vmatprep.mubr.bf16.mxu1 %v2273_v56  ;;  %v2354_v56 = vld [vmem:[%s3192_s3] sm:$0xff]  }
  0x77   :  { %1310 = vmatpush2.bf16.msra.mxu0 %v2268_v57 }
  0x78   :  { %2087 = vmatpush2.bf16.msra.mxu1 %v2268_v57  ;;  %1311 = vmatprep.subr.bf16.mxu0 %v2279_v58  ;;  %v199_v57 = vlaneseq }
  0x79   :  { %2072 = vmatprep.subr.bf16.mxu1 %v2279_v58 }
  0x7a   :  { %1160 = vmatmul.mubr.bf16.gmra.mxu0 %v2275_v59  ;;  %v200_v58 = vshrl.u32 %v199_v57, 7 }
  0x7b   :  { %1273 = vmatmul.mubr.bf16.gmra.mxu1 %v2276_v60  ;;  %1312 = vmatpush2.bf16.msra.mxu0 %v2277_v61  ;;  %v197_v60 = vld [vmem:[%s3193_s2] sm:$0x3] }
  0x7c   :  { %2088 = vmatpush2.bf16.msra.mxu1 %v2277_v61  ;;  %1313 = vmatprep.subr.bf16.mxu0 %v2282_v62  ;;  %v201_v59 = vsub.s32 0, %v200_v58  ;;  %v205_v61 = vsub.s32 1, %v200_v58 }
  0x7d   :  { %2073 = vmatprep.subr.bf16.mxu1 %v2282_v62  ;;  %1315 = vmatprep.mubr.bf16.mxu0 %v2285_v63 }
  0x7e   :  { %1355 = vmatprep.mubr.bf16.mxu1 %v2288_v0  ;;  %v2941_v62 = vrot.slane %v197_v60, %v201_v59  ;;  %v2943_v63 = vrot.slane %v197_v60, %v205_v61 }
  0x7f   :  { %1314 = vmatpush2.bf16.msra.mxu0 %v2280_v1 }
  0x80   :  { %2089 = vmatpush2.bf16.msra.mxu1 %v2280_v1  ;;  %1994 = vmatprep.subr.bf16.mxu0 %v2339_v40 }
  0x81   :  { %1396 = vmatprep.subr.bf16.mxu1 %v2291_v2 }
  0x82   :  { %1316 = vmatmul.mubr.bf16.vlgmr.msra.gmra.mxu0 %v2283_v3 }
  0x83   :  { %1356 = vmatmul.mubr.bf16.vlgmr.msra.gmra.mxu1 %v2286_v4  ;;  %1325 = vmatprep.mubr.bf16.mxu0 %v2295_v6 }
  0x84   :  { %1397 = vmatpush1.bf16.msra.mxu1 %v2289_v5  ;;  %1365 = vmatprep.mubr.bf16.mxu1 %v2297_v8 }
  0x85   :  { %1398 = vmatprep.subr.bf16.mxu1 %v2294_v7  ;;  %1995 = vmatpush3.bf16.msra.mxu0 %v2340_v41 }
  0x86   :  { %1996 = vmatprep.subr.bf16.mxu0 %v2341_v42 }
  0x88   :  { %1399 = vmatpush1.bf16.msra.mxu1 %v2292_v9 }
  0x89   :  { %1400 = vmatprep.subr.bf16.mxu1 %v2303_v10  ;;  %1997 = vmatpush3.bf16.msra.mxu0 %v2342_v43 }
  0x8a   :  { %1326 = vmatmul.mubr.bf16.gmra.mxu0 %v2299_v11  ;;  %1998 = vmatprep.subr.bf16.mxu0 %v2343_v45 }
  0x8b   :  { %1366 = vmatmul.mubr.bf16.gmra.mxu1 %v2300_v12  ;;  %1335 = vmatprep.mubr.bf16.mxu0 %v2307_v14 }
  0x8c   :  { %1401 = vmatpush1.bf16.msra.mxu1 %v2301_v13  ;;  %1375 = vmatprep.mubr.bf16.mxu1 %v2309_v16 }
  0x8d   :  { %1402 = vmatprep.subr.bf16.mxu1 %v2306_v15  ;;  %1999 = vmatpush3.bf16.msra.mxu0 %v2344_v46 }
  0x8e   :  { %2000 = vmatprep.subr.bf16.mxu0 %v2345_v47 }
  0x90   :  { %1403 = vmatpush1.bf16.msra.mxu1 %v2304_v17 }
  0x91   :  { %1404 = vmatprep.subr.bf16.mxu1 %v2315_v18  ;;  %2001 = vmatpush3.bf16.msra.mxu0 %v2346_v48 }
  0x92   :  { %1336 = vmatmul.mubr.bf16.gmra.mxu0 %v2311_v19  ;;  %2002 = vmatprep.subr.bf16.mxu0 %v2347_v49 }
  0x93   :  { %1376 = vmatmul.mubr.bf16.gmra.mxu1 %v2312_v20  ;;  %1345 = vmatprep.mubr.bf16.mxu0 %v2319_v22 }
  0x94   :  { %1405 = vmatpush1.bf16.msra.mxu1 %v2313_v21  ;;  %1385 = vmatprep.mubr.bf16.mxu1 %v2321_v24 }
  0x95   :  { %1406 = vmatprep.subr.bf16.mxu1 %v2318_v23  ;;  %2003 = vmatpush3.bf16.msra.mxu0 %v2348_v50 }
  0x96   :  { %2004 = vmatprep.subr.bf16.mxu0 %v2349_v51 }
  0x98   :  { %1407 = vmatpush1.bf16.msra.mxu1 %v2316_v25 }
  0x99   :  { %1408 = vmatprep.subr.bf16.mxu1 %v2327_v26  ;;  %2005 = vmatpush3.bf16.msra.mxu0 %v2350_v52 }
  0x9a   :  { %1346 = vmatmul.mubr.bf16.gmra.mxu0 %v2323_v27  ;;  %2006 = vmatprep.subr.bf16.mxu0 %v2351_v53 }
  0x9b   :  { %1386 = vmatmul.mubr.bf16.gmra.mxu1 %v2324_v28 }
  0x9c   :  { %1409 = vmatpush1.bf16.msra.mxu1 %v2325_v29  ;;  %1428 = vmatprep.mubr.bf16.mxu1 %v2355_v32 }
  0x9d   :  { %1410 = vmatprep.subr.bf16.mxu1 %v2330_v30  ;;  %2007 = vmatpush3.bf16.msra.mxu0 %v2352_v54 }
  0x9e   :  { %2008 = vmatprep.subr.bf16.mxu0 %v2353_v55 }
  0xa0   :  { %1411 = vmatpush1.bf16.msra.mxu1 %v2328_v31 }
  0xa1   :  { %2009 = vmatpush3.bf16.msra.mxu0 %v2354_v56 }
  0xa3   :  { %1429 = vmatmul.mubr.bf16.vlgmr.msra.gmra.mxu1 %v2331_v33 }
  0xa4   :  { %1438 = vmatprep.mubr.bf16.mxu1 %v2355_v32 }
  0xab   :  { %1439 = vmatmul.mubr.bf16.gmra.mxu1 %v2332_v34 }
  0xac   :  { %1448 = vmatprep.mubr.bf16.mxu1 %v2355_v32 }
  0xb3   :  { %1449 = vmatmul.mubr.bf16.gmra.mxu1 %v2333_v35 }
  0xb4   :  { %1458 = vmatprep.mubr.bf16.mxu1 %v2355_v32 }
  0xbb   :  { %1459 = vmatmul.mubr.bf16.gmra.mxu1 %v2334_v36 }
  0xbc   :  { %1468 = vmatprep.mubr.bf16.mxu1 %v2355_v32 }
  0xc3   :  { %1469 = vmatmul.mubr.bf16.gmra.mxu1 %v2335_v37 }
  0xc4   :  { %1478 = vmatprep.mubr.bf16.mxu1 %v2355_v32 }
  0xcb   :  { %1479 = vmatmul.mubr.bf16.gmra.mxu1 %v2336_v38 }
  0xcc   :  { %1488 = vmatprep.mubr.bf16.mxu1 %v2355_v32 }
  0xd3   :  { %1489 = vmatmul.mubr.bf16.gmra.mxu1 %v2337_v39 }
  0xd4   :  { %1498 = vmatprep.mubr.bf16.mxu1 %v2355_v32 }
  0xdb   :  { %1499 = vmatmul.mubr.bf16.gmra.mxu1 %v2338_v44 }
 0x102   :  { %v1091_v0 = vpop.f32.mrf.mxu0 }
 0x103   :  { %v1204_v1 = vpop.f32.mrf.mxu1  ;;  %v1092_v2 = vadd.f32 %v1091_v0, %v2941_v62 }
 0x104   :  { %v1093_v3 = vpop.f32.mrf.mxu0 }
 0x105   :  { %v1206_v4 = vpop.f32.mrf.mxu1  ;;  %v2946_v5 = vadd.f32 %v1204_v1, %v1092_v2  ;;  %v1094_v6 = vadd.f32 %v1093_v3, %v2943_v63 }
 0x106   :  { %v2949_v7 = vpop.f32.mrf.mxu0 }
 0x107   :  { %v2951_v8 = vpop.f32.mrf.mxu1  ;;  %v2953_v9 = vadd.f32 %v1206_v4, %v1094_v6 }
 0x108   :  { %v2955_v10 = vpop.f32.mrf.mxu0 }
 0x109   :  { %v2957_v11 = vpop.f32.mrf.mxu1 }
 0x10a   :  { %v1101_v12 = vpop.f32.mrf.mxu0 }
 0x10b   :  { %v1214_v13 = vpop.f32.mrf.mxu1  ;;  %v1102_v14 = vadd.f32 %v1101_v12, %v2941_v62 }
 0x10c   :  { %v1103_v15 = vpop.f32.mrf.mxu0 }
 0x10d   :  { %v1216_v16 = vpop.f32.mrf.mxu1  ;;  %v2960_v17 = vadd.f32 %v1214_v13, %v1102_v14  ;;  %v1104_v18 = vadd.f32 %v1103_v15, %v2943_v63 }
 0x10e   :  { %v2963_v19 = vpop.f32.mrf.mxu0 }
 0x10f   :  { %v2965_v20 = vpop.f32.mrf.mxu1  ;;  %v2967_v21 = vadd.f32 %v1216_v16, %v1104_v18 }
 0x110   :  { %v2969_v22 = vpop.f32.mrf.mxu0 }
 0x111   :  { %v2971_v23 = vpop.f32.mrf.mxu1 }
 0x112   :  { %v1111_v24 = vpop.f32.mrf.mxu0 }
 0x113   :  { %v1224_v25 = vpop.f32.mrf.mxu1  ;;  %v1112_v26 = vadd.f32 %v1111_v24, %v2941_v62 }
 0x114   :  { %v1113_v27 = vpop.f32.mrf.mxu0 }
 0x115   :  { %v1226_v28 = vpop.f32.mrf.mxu1  ;;  %v2974_v29 = vadd.f32 %v1224_v25, %v1112_v26  ;;  %v1114_v30 = vadd.f32 %v1113_v27, %v2943_v63 }
 0x116   :  { %v2977_v31 = vpop.f32.mrf.mxu0 }
 0x117   :  { %v2979_v32 = vpop.f32.mrf.mxu1  ;;  %v2981_v33 = vadd.f32 %v1226_v28, %v1114_v30 }
 0x118   :  { %v2983_v34 = vpop.f32.mrf.mxu0 }
 0x119   :  { %v2985_v35 = vpop.f32.mrf.mxu1 }
 0x11a   :  { %v1121_v36 = vpop.f32.mrf.mxu0 }
 0x11b   :  { %v1234_v37 = vpop.f32.mrf.mxu1  ;;  %v1122_v38 = vadd.f32 %v1121_v36, %v2941_v62 }
 0x11c   :  { %v1123_v39 = vpop.f32.mrf.mxu0 }
 0x11d   :  { %v1236_v40 = vpop.f32.mrf.mxu1  ;;  %v2988_v41 = vadd.f32 %v1234_v37, %v1122_v38  ;;  %v1124_v42 = vadd.f32 %v1123_v39, %v2943_v63 }
 0x11e   :  { %v2991_v43 = vpop.f32.mrf.mxu0 }
 0x11f   :  { %v2993_v44 = vpop.f32.mrf.mxu1  ;;  %v2995_v45 = vadd.f32 %v1236_v40, %v1124_v42 }
 0x120   :  { %v2997_v46 = vpop.f32.mrf.mxu0 }
 0x121   :  { %v2999_v47 = vpop.f32.mrf.mxu1 }
 0x122   :  { %v1131_v48 = vpop.f32.mrf.mxu0 }
 0x123   :  { %v1244_v49 = vpop.f32.mrf.mxu1  ;;  %v1132_v50 = vadd.f32 %v1131_v48, %v2941_v62 }
 0x124   :  { %v1133_v51 = vpop.f32.mrf.mxu0 }
 0x125   :  { %v1246_v52 = vpop.f32.mrf.mxu1  ;;  %v1245_v53 = vadd.f32 %v1244_v49, %v1132_v50  ;;  %v1134_v54 = vadd.f32 %v1133_v51, %v2943_v63 }
 0x126   :  { %v1135_v55 = vpop.f32.mrf.mxu0 }
 0x127   :  { %v1248_v56 = vpop.f32.mrf.mxu1  ;;  %v1247_v57 = vadd.f32 %v1246_v52, %v1134_v54 }
 0x128   :  { %v3003_v58 = vpop.f32.mrf.mxu0 }
 0x129   :  { %v3005_v59 = vpop.f32.mrf.mxu1 }
 0x12a   :  { %v1141_v60 = vpop.f32.mrf.mxu0 }
 0x12b   :  { %v1254_v61 = vpop.f32.mrf.mxu1  ;;  %v1142_v0 = vadd.f32 %v1141_v60, %v2941_v62 }
 0x12c   :  { %v1143_v1 = vpop.f32.mrf.mxu0 }
 0x12d   :  { %v1256_v2 = vpop.f32.mrf.mxu1  ;;  %v1255_v3 = vadd.f32 %v1254_v61, %v1142_v0  ;;  %v1144_v4 = vadd.f32 %v1143_v1, %v2943_v63 }
 0x12e   :  { %v1145_v6 = vpop.f32.mrf.mxu0 }
 0x12f   :  { %v1258_v12 = vpop.f32.mrf.mxu1  ;;  %v1257_v13 = vadd.f32 %v1256_v2, %v1144_v4  ;;  %v1136_v2 = vadd.f32 %v1135_v55, %v2941_v62 }
 0x130   :  { %v3009_v14 = vpop.f32.mrf.mxu0 }
 0x131   :  { %v3011_v15 = vpop.f32.mrf.mxu1 }
 0x132   :  { %v1151_v16 = vpop.f32.mrf.mxu0 }
 0x133   :  { %v1264_v18 = vpop.f32.mrf.mxu1  ;;  %v1152_v24 = vadd.f32 %v1151_v16, %v2941_v62 }
 0x134   :  { %v1153_v25 = vpop.f32.mrf.mxu0 }
 0x135   :  { %v1266_v26 = vpop.f32.mrf.mxu1  ;;  %v1265_v27 = vadd.f32 %v1264_v18, %v1152_v24  ;;  %v1154_v28 = vadd.f32 %v1153_v25, %v2943_v63 }
 0x136   :  { %v1155_v30 = vpop.f32.mrf.mxu0 }
 0x137   :  { %v1268_v36 = vpop.f32.mrf.mxu1  ;;  %v1267_v37 = vadd.f32 %v1266_v26, %v1154_v28  ;;  %v1249_v26 = vadd.f32 %v1248_v56, %v1136_v2 }
 0x138   :  { %v3015_v38 = vpop.f32.mrf.mxu0 }
 0x139   :  { %3196 = vst [vmem:[#allocation2_spill] sm:$0xff] %v3015_v38  ;;  %v3017_v39 = vpop.f32.mrf.mxu1 }
 0x13a   :  { %3197 = vst [vmem:[#allocation3_spill] sm:$0xff] %v3017_v39  ;;  %v1161_v40 = vpop.f32.mrf.mxu0 }
 0x13b   :  { %v1274_v42 = vpop.f32.mrf.mxu1  ;;  %v1162_v48 = vadd.f32 %v1161_v40, %v2941_v62 }
 0x13c   :  { %v1163_v49 = vpop.f32.mrf.mxu0 }
 0x13d   :  { %v1276_v50 = vpop.f32.mrf.mxu1  ;;  %v1275_v51 = vadd.f32 %v1274_v42, %v1162_v48  ;;  %v1164_v52 = vadd.f32 %v1163_v49, %v2943_v63 }
 0x13e   :  { %v1165_v54 = vpop.f32.mrf.mxu0 }
 0x13f   :  { %v1278_v60 = vpop.f32.mrf.mxu1  ;;  %v1277_v61 = vadd.f32 %v1276_v50, %v1164_v52  ;;  %v1146_v50 = vadd.f32 %v1145_v6, %v2941_v62 }
 0x140   :  { %v3021_v0 = vpop.f32.mrf.mxu0 }
 0x141   :  { %3198 = vst [vmem:[#allocation4_spill] sm:$0xff] %v3021_v0  ;;  %v3023_v1 = vpop.f32.mrf.mxu1 }
 0x142   :  { %3199 = vst [vmem:[#allocation5_spill] sm:$0xff] %v3023_v1  ;;  %v1317_v4 = vpop.f32.mrf.mxu0 }
 0x143   :  { %v1357_v16 = vpop.f32.mrf.mxu1 }
 0x144   :  { %v3026_v18 = vadd.f32 %v1357_v16, %v1245_v53  ;;  %v1319_v24 = vpop.f32.mrf.mxu0  ;;  %v1259_v53 = vadd.f32 %v1258_v12, %v1146_v50 }
 0x145   :  { %v1359_v25 = vpop.f32.mrf.mxu1 }
 0x146   :  { %v3028_v28 = vadd.f32 %v1359_v25, %v1247_v57  ;;  %v1321_v48 = vpop.f32.mrf.mxu0  ;;  %v1156_v25 = vadd.f32 %v1155_v30, %v2941_v62 }
 0x147   :  { %v1361_v40 = vpop.f32.mrf.mxu1 }
 0x148   :  { %v3030_v42 = vadd.f32 %v1361_v40, %v1249_v26  ;;  %v1323_v55 = vpop.f32.mrf.mxu0 }
 0x149   :  { %v3032_v49 = vpop.f32.mrf.mxu1 }
 0x14a   :  { %v1327_v57 = vpop.f32.mrf.mxu0 }
 0x14b   :  { %v1367_v52 = vpop.f32.mrf.mxu1 }
 0x14c   :  { %v3035_v1 = vadd.f32 %v1367_v52, %v1255_v3  ;;  %v1329_v6 = vpop.f32.mrf.mxu0  ;;  %v1269_v3 = vadd.f32 %v1268_v36, %v1156_v25  ;;  %v1096_v36 = vadd.f32 %v2949_v7, %v2941_v62 }
 0x14d   :  { %v1369_v0 = vpop.f32.mrf.mxu1 }
 0x14e   :  { %3200 = vst [vmem:[#allocation6_spill] sm:$0xff] %v3035_v1  ;;  %v3037_v16 = vadd.f32 %v1369_v0, %v1257_v13  ;;  %v1331_v13 = vpop.f32.mrf.mxu0 }
 0x14f   :  { %v1371_v39 = vpop.f32.mrf.mxu1 }
 0x150   :  { %v3039_v56 = vadd.f32 %v1371_v39, %v1259_v53  ;;  %v1166_v39 = vadd.f32 %v1165_v54, %v2941_v62  ;;  %v1333_v30 = vpop.f32.mrf.mxu0  ;;  %v1098_v54 = vadd.f32 %v2955_v10, %v2943_v63 }
 0x151   :  { %v3041_v2 = vpop.f32.mrf.mxu1 }
 0x152   :  { %3201 = vst [vmem:[#allocation7_spill] sm:$0xff] %v3039_v56 }
 0x153   :  { %v1377_v26 = vpop.f32.mrf.mxu1 }
 0x154   :  { %v3044_v40 = vadd.f32 %v1377_v26, %v1265_v27  ;;  %v1279_v27 = vadd.f32 %v1278_v60, %v1166_v39  ;;  %v1320_v39 = vadd.f32 %v1319_v24, %v2953_v9  ;;  %v1328_v24 = vadd.f32 %v1327_v57, %v2960_v17 }
 0x155   :  { %v1379_v38 = vpop.f32.mrf.mxu1  ;;  %v1118_v17 = vadd.f32 %v2983_v34, %v2943_v63 }
 0x156   :  { %3202 = vst [vmem:[#allocation8_spill] sm:$0xff] %v3044_v40  ;;  %v3046_v52 = vadd.f32 %v1379_v38, %v1267_v37  ;;  %v1337_v38 = vpop.f32.mrf.mxu0 }
 0x157   :  { %v1381_v1 = vpop.f32.mrf.mxu1 }
 0x158   :  { %v3048_v12 = vadd.f32 %v1381_v1, %v1269_v3  ;;  %v1318_v3 = vadd.f32 %v1317_v4, %v2946_v5  ;;  %v1339_v60 = vpop.f32.mrf.mxu0 }
 0x159   :  { %v3050_v0 = vpop.f32.mrf.mxu1  ;;  %v1340_v34 = vadd.f32 %v1339_v60, %v2981_v33 }
 0x15b   :  { %v1387_v50 = vpop.f32.mrf.mxu1 }
 0x15c   :  { %v3053_v53 = vadd.f32 %v1387_v50, %v1275_v51  ;;  %v1209_v51 = vadd.f32 %v2951_v8, %v1096_v36  ;;  %v1106_v50 = vadd.f32 %v2963_v19, %v2941_v62  ;;  %v1108_v8 = vadd.f32 %v2969_v22, %v2943_v63  ;;  %v1341_v36 = vpop.f32.mrf.mxu0 }
 0x15d   :  { %v1389_v56 = vpop.f32.mrf.mxu1 }
 0x15e   :  { %3203 = vst [vmem:[#allocation9_spill] sm:$0xff] %v3053_v53  ;;  %v3055_v26 = vadd.f32 %v1389_v56, %v1277_v61  ;;  %v1211_v56 = vadd.f32 %v2957_v11, %v1098_v54  ;;  %v1322_v7 = vadd.f32 %v1321_v48, %v1209_v51  ;;  %v1219_v11 = vadd.f32 %v2965_v20, %v1106_v50 }
 0x15f   :  { %v1391_v40 = vpop.f32.mrf.mxu1 }
 0x160   :  { %3204 = vst [vmem:[#allocation10_spill] sm:$0xff] %v3055_v26  ;;  %v3059_v37 = vadd.f32 %v1391_v40, %v1279_v27  ;;  %v1332_v22 = vadd.f32 %v1331_v13, %v1219_v11 }
 0x161   :  { %v3061_v1 = vpop.f32.mrf.mxu1 }
 0x162   :  { %3205 = vst [vmem:[#allocation11_spill] sm:$0xff] %v3059_v37  ;;  %3206 = vst [vmem:[#allocation12_spill] sm:$0xff] %v3061_v1  ;;  %v1324_v37 = vadd.f32 %v1323_v55, %v1211_v56  ;;  %v1221_v55 = vadd.f32 %v2971_v23, %v1108_v8 }
 0x163   :  { %v1430_v25 = vpop.f32.mrf.mxu1 }
 0x164   :  { %v1431_v40 = vadd.f32 %v1430_v25, %v1318_v3  ;;  %v1343_v25 = vpop.f32.mrf.mxu0  ;;  %v1330_v3 = vadd.f32 %v1329_v6, %v2967_v21  ;;  %v1334_v20 = vadd.f32 %v1333_v30, %v1221_v55 }
 0x165   :  { %v1432_v61 = vpop.f32.mrf.mxu1 }
 0x166   :  { %v1433_v26 = vadd.f32 %v1432_v61, %v1320_v39  ;;  %v1509_v4 = vmax.f32 %v1431_v40, 0.0  ;;  %v1347_v57 = vpop.f32.mrf.mxu0 }
 0x167   :  { %v1434_v27 = vpop.f32.mrf.mxu1 }
 0x168   :  { %v1435_v10 = vadd.f32 %v1434_v27, %v1322_v7  ;;  %v1510_v48 = vmax.f32 %v1433_v26, 0.0  ;;  %v1231_v27 = vadd.f32 %v2985_v35, %v1118_v17 }
 0x169   :  { %v1436_v5 = vpop.f32.mrf.mxu1 }
 0x16a   :  { %v1511_v1 = vmax.f32 %v1435_v10, 0.0  ;;  %v1437_v53 = vadd.f32 %v1436_v5, %v1324_v37  ;;  %v1116_v37 = vadd.f32 %v2977_v31, %v2941_v62  ;;  %v1349_v10 = vpop.f32.mrf.mxu0 }
 0x16b   :  { %v1440_v9 = vpop.f32.mrf.mxu1 }
 0x16c   :  { %v1541_v54 = vpack.c.bf16 %v1511_v1, %v1509_v4  ;;  %v1512_v19 = vmax.f32 %v1437_v53, 0.0  ;;  %v1441_v56 = vadd.f32 %v1440_v9, %v1328_v24  ;;  %v1229_v6 = vadd.f32 %v2979_v32, %v1116_v37 }
 0x16d   :  { %v1442_v51 = vpop.f32.mrf.mxu1  ;;  %v1338_v1 = vadd.f32 %v1337_v38, %v2974_v29  ;;  %v1126_v9 = vadd.f32 %v2991_v43, %v2941_v62  ;;  %v1344_v32 = vadd.f32 %v1343_v25, %v1231_v27  ;;  %v1128_v29 = vadd.f32 %v2997_v46, %v2943_v63  ;;  %v1351_v38 = vpop.f32.mrf.mxu0 }
 0x16e   :  { %v1542_v61 = vpack.c.bf16 %v1512_v19, %v1510_v48  ;;  %v1443_v7 = vadd.f32 %v1442_v51, %v1330_v3  ;;  %v1513_v53 = vmax.f32 %v1441_v56, 0.0  ;;  %v1342_v5 = vadd.f32 %v1341_v36, %v1229_v6 }
 0x16f   :  { %v1444_v39 = vpop.f32.mrf.mxu1  ;;  %v1239_v60 = vadd.f32 %v2993_v44, %v1126_v9  ;;  %v1348_v51 = vadd.f32 %v1347_v57, %v2988_v41  ;;  %v1241_v3 = vadd.f32 %v2999_v47, %v1128_v29  ;;  %v1350_v46 = vadd.f32 %v1349_v10, %v2995_v45 }
 0x170   :  { %v1445_v40 = vadd.f32 %v1444_v39, %v1332_v22  ;;  %1724 = vmatprep.mubr.bf16.mxu0 %v1542_v61  ;;  %v1514_v31 = vmax.f32 %v1443_v7, 0.0  ;;  %v1353_v22 = vpop.f32.mrf.mxu0  ;;  %v1138_v41 = vadd.f32 %v3003_v58, %v2943_v63 }
 0x171   :  { %v1446_v23 = vpop.f32.mrf.mxu1  ;;  %1725 = vmatmul.mubr.bf16.vlgmr.msra.gmra.mxu0 %v1541_v54  ;;  %v1352_v56 = vadd.f32 %v1351_v38, %v1239_v60  ;;  %v1354_v7 = vadd.f32 %v1353_v22, %v1241_v3  ;;  %v3208_v38 = vld [vmem:[#allocation7_spill] sm:$0xff] }
 0x172   :  { %v1515_v26 = vmax.f32 %v1445_v40, 0.0  ;;  %v1447_v21 = vadd.f32 %v1446_v23, %v1334_v20  ;;  %v3210_v3 = vld [vmem:[#allocation3_spill] sm:$0xff] }
 0x173   :  { %v1450_v13 = vpop.f32.mrf.mxu1 }
 0x174   :  { %v1543_v50 = vpack.c.bf16 %v1515_v26, %v1513_v53  ;;  %v1516_v30 = vmax.f32 %v1447_v21, 0.0  ;;  %v1451_v11 = vadd.f32 %v1450_v13, %v1338_v1  ;;  %v1251_v13 = vadd.f32 %v3005_v59, %v1138_v41 }
 0x175   :  { %v1452_v8 = vpop.f32.mrf.mxu1 }
 0x176   :  { %v1544_v4 = vpack.c.bf16 %v1516_v30, %v1514_v31  ;;  %v1453_v48 = vadd.f32 %v1452_v8, %v1340_v34  ;;  %v1517_v19 = vmax.f32 %v1451_v11, 0.0  ;;  %v1364_v30 = vadd.f32 %v3032_v49, %v1251_v13  ;;  %v3215_v13 = vld [vmem:[#allocation12_spill] sm:$0xff] }
 0x177   :  { %v1454_v24 = vpop.f32.mrf.mxu1  ;;  %v1148_v8 = vadd.f32 %v3009_v14, %v2943_v63 }
 0x178   :  { %v1455_v54 = vadd.f32 %v1454_v24, %v1342_v5  ;;  %1732 = vmatprep.mubr.bf16.mxu0 %v1544_v4  ;;  %v1518_v62 = vmax.f32 %v1453_v48, 0.0 }
 0x179   :  { %v1456_v35 = vpop.f32.mrf.mxu1  ;;  %1733 = vmatmul.mubr.bf16.gmra.mxu0 %v1543_v50  ;;  %v1261_v49 = vadd.f32 %v3011_v15, %v1148_v8 }
 0x17a   :  { %v1519_v55 = vmax.f32 %v1455_v54, 0.0  ;;  %v1457_v33 = vadd.f32 %v1456_v35, %v1344_v32 }
 0x17b   :  { %v1460_v36 = vpop.f32.mrf.mxu1  ;;  %v1374_v54 = vadd.f32 %v3041_v2, %v1261_v49 }
 0x17c   :  { %v1545_v43 = vpack.c.bf16 %v1519_v55, %v1517_v19  ;;  %v1520_v25 = vmax.f32 %v1457_v33, 0.0  ;;  %v1461_v39 = vadd.f32 %v1460_v36, %v1348_v51  ;;  %v3209_v19 = vld [vmem:[#allocation2_spill] sm:$0xff] }
 0x17d   :  { %v1462_v61 = vpop.f32.mrf.mxu1  ;;  %v1158_v55 = vadd.f32 %v3209_v19, %v2943_v63 }
 0x17e   :  { %v1546_v37 = vpack.c.bf16 %v1520_v25, %v1518_v62  ;;  %v1463_v40 = vadd.f32 %v1462_v61, %v1350_v46  ;;  %v1521_v57 = vmax.f32 %v1461_v39, 0.0 }
 0x17f   :  { %v1464_v20 = vpop.f32.mrf.mxu1  ;;  %v1271_v2 = vadd.f32 %v3210_v3, %v1158_v55 }
 0x180   :  { %v1465_v17 = vadd.f32 %v1464_v20, %v1352_v56  ;;  %1740 = vmatprep.mubr.bf16.mxu0 %v1546_v37  ;;  %v1522_v26 = vmax.f32 %v1463_v40, 0.0 }
 0x181   :  { %v1466_v44 = vpop.f32.mrf.mxu1  ;;  %1741 = vmatmul.mubr.bf16.gmra.mxu0 %v1545_v43  ;;  %v1384_v56 = vadd.f32 %v3050_v0, %v1271_v2 }
 0x182   :  { %v1523_v23 = vmax.f32 %v1465_v17, 0.0  ;;  %v1467_v47 = vadd.f32 %v1466_v44, %v1354_v7  ;;  %v3212_v7 = vld [vmem:[#allocation4_spill] sm:$0xff] }
 0x183   :  { %v1470_v53 = vpop.f32.mrf.mxu1  ;;  %v1168_v40 = vadd.f32 %v3212_v7, %v2943_v63 }
 0x184   :  { %v1547_v21 = vpack.c.bf16 %v1523_v23, %v1521_v57  ;;  %v1524_v45 = vmax.f32 %v1467_v47, 0.0  ;;  %v1471_v31 = vadd.f32 %v1470_v53, %v3026_v18 }
 0x185   :  { %v1472_v6 = vpop.f32.mrf.mxu1 }
 0x186   :  { %v1548_v1 = vpack.c.bf16 %v1524_v45, %v1522_v26  ;;  %v1473_v27 = vadd.f32 %v1472_v6, %v3028_v28  ;;  %v1525_v34 = vmax.f32 %v1471_v31, 0.0  ;;  %v3207_v28 = vld [vmem:[#allocation6_spill] sm:$0xff] }
 0x187   :  { %v1474_v50 = vpop.f32.mrf.mxu1  ;;  %v3216_v31 = vld [vmem:[#allocation10_spill] sm:$0xff] }
 0x188   :  { %v1475_v58 = vadd.f32 %v1474_v50, %v3030_v42  ;;  %1748 = vmatprep.mubr.bf16.mxu0 %v1548_v1  ;;  %v1526_v11 = vmax.f32 %v1473_v27, 0.0 }
 0x189   :  { %v1476_v10 = vpop.f32.mrf.mxu1  ;;  %1749 = vmatmul.mubr.bf16.gmra.mxu0 %v1547_v21  ;;  %v3213_v21 = vld [vmem:[#allocation5_spill] sm:$0xff] }
 0x18a   :  { %v1527_v5 = vmax.f32 %v1475_v58, 0.0  ;;  %v1477_v4 = vadd.f32 %v1476_v10, %v1364_v30  ;;  %v1281_v0 = vadd.f32 %v3213_v21, %v1168_v40  ;;  %v3217_v30 = vld [vmem:[#allocation11_spill] sm:$0xff] }
 0x18b   :  { %v1480_v59 = vpop.f32.mrf.mxu1 }
 0x18c   :  { %v1549_v9 = vpack.c.bf16 %v1527_v5, %v1525_v34  ;;  %v1528_v18 = vmax.f32 %v1477_v4, 0.0  ;;  %v1481_v48 = vadd.f32 %v1480_v59, %v3207_v28  ;;  %v1394_v1 = vadd.f32 %v3215_v13, %v1281_v0 }
 0x18d   :  { %v1482_v24 = vpop.f32.mrf.mxu1 }
 0x18e   :  { %v1550_v32 = vpack.c.bf16 %v1528_v18, %v1526_v11  ;;  %v1483_v29 = vadd.f32 %v1482_v24, %v3037_v16  ;;  %v1529_v33 = vmax.f32 %v1481_v48, 0.0  ;;  %v3211_v16 = vld [vmem:[#allocation8_spill] sm:$0xff] }
 0x18f   :  { %v1484_v42 = vpop.f32.mrf.mxu1 }
 0x190   :  { %v1485_v14 = vadd.f32 %v1484_v42, %v3208_v38  ;;  %1756 = vmatprep.mubr.bf16.mxu0 %v1550_v32  ;;  %v1530_v51 = vmax.f32 %v1483_v29, 0.0 }
 0x191   :  { %v1486_v35 = vpop.f32.mrf.mxu1  ;;  %1757 = vmatmul.mubr.bf16.gmra.mxu0 %v1549_v9  ;;  %v3124_v9 = vld [vmem:[%s3194_s4] ss:$0 sm:$0xff] }
 0x192   :  { %v1531_v60 = vmax.f32 %v1485_v14, 0.0  ;;  %v1487_v36 = vadd.f32 %v1486_v35, %v1374_v54 }
 0x193   :  { %v1490_v15 = vpop.f32.mrf.mxu1 }
 0x194   :  { %v1551_v62 = vpack.c.bf16 %v1531_v60, %v1529_v33  ;;  %v1532_v43 = vmax.f32 %v1487_v36, 0.0  ;;  %v1491_v61 = vadd.f32 %v1490_v15, %v3211_v16 }
 0x195   :  { %v1492_v25 = vpop.f32.mrf.mxu1 }
 0x196   :  { %v1552_v22 = vpack.c.bf16 %v1532_v43, %v1530_v51  ;;  %v1493_v37 = vadd.f32 %v1492_v25, %v3046_v52  ;;  %v1533_v17 = vmax.f32 %v1491_v61, 0.0  ;;  %v3214_v52 = vld [vmem:[#allocation9_spill] sm:$0xff] }
 0x197   :  { %v1494_v46 = vpop.f32.mrf.mxu1 }
 0x198   :  { %v1495_v39 = vadd.f32 %v1494_v46, %v3048_v12  ;;  %1764 = vmatprep.mubr.bf16.mxu0 %v1552_v22  ;;  %v1534_v23 = vmax.f32 %v1493_v37, 0.0 }
 0x199   :  { %v1496_v20 = vpop.f32.mrf.mxu1  ;;  %1765 = vmatmul.mubr.bf16.gmra.mxu0 %v1551_v62 }
 0x19a   :  { %v1535_v44 = vmax.f32 %v1495_v39, 0.0  ;;  %v1497_v41 = vadd.f32 %v1496_v20, %v1384_v56 }
 0x19b   :  { %v1500_v57 = vpop.f32.mrf.mxu1 }
 0x19c   :  { %v1553_v47 = vpack.c.bf16 %v1535_v44, %v1533_v17  ;;  %v1536_v53 = vmax.f32 %v1497_v41, 0.0  ;;  %v1501_v6 = vadd.f32 %v1500_v57, %v3214_v52 }
 0x19d   :  { %v1502_v26 = vpop.f32.mrf.mxu1 }
 0x19e   :  { %v1554_v45 = vpack.c.bf16 %v1536_v53, %v1534_v23  ;;  %v1503_v50 = vadd.f32 %v1502_v26, %v3216_v31  ;;  %v1537_v58 = vmax.f32 %v1501_v6, 0.0 }
 0x19f   :  { %v1504_v12 = vpop.f32.mrf.mxu1 }
 0x1a0   :  { %v1505_v63 = vadd.f32 %v1504_v12, %v3217_v30  ;;  %1772 = vmatprep.mubr.bf16.mxu0 %v1554_v45  ;;  %v1538_v34 = vmax.f32 %v1503_v50, 0.0 }
 0x1a1   :  { %v1506_v27 = vpop.f32.mrf.mxu1  ;;  %1773 = vmatmul.mubr.bf16.gmra.mxu0 %v1553_v47 }
 0x1a2   :  { %v1539_v10 = vmax.f32 %v1505_v63, 0.0  ;;  %v1507_v8 = vadd.f32 %v1506_v27, %v1394_v1 }
 0x1a4   :  { %v1555_v5 = vpack.c.bf16 %v1539_v10, %v1537_v58  ;;  %v1540_v4 = vmax.f32 %v1507_v8, 0.0 }
 0x1a6   :  { %v1556_v59 = vpack.c.bf16 %v1540_v4, %v1538_v34 }
 0x1a8   :  { %1780 = vmatprep.mubr.bf16.mxu0 %v1556_v59 }
 0x1a9   :  { %1781 = vmatmul.mubr.bf16.gmra.mxu0 %v1555_v5 }
 0x231   :  { %v2010_v11 = vpop.f32.mrf.mxu0 }
 0x233   :  { %v2011_v18 = vpop.f32.mrf.mxu0 }
 0x234   :  { %v2012_v24 = vadd.f32 %v2011_v18, %v2010_v11 }
 0x235   :  { %v2013_v49 = vpop.f32.mrf.mxu0 }
 0x236   :  { %v1727_v32 = vadd.f32 %v2012_v24, %v3124_v9 }
 0x237   :  { %v2014_v28 = vpop.f32.mrf.mxu0 }
 0x238   :  { %1789 = vst [vmem:[%s3195_s5] sm:$0xff] %v1727_v32  ;;  %v2015_v48 = vadd.f32 %v2014_v28, %v2013_v49 }
 0x239   :  { %v2016_v42 = vpop.f32.mrf.mxu0 }
 0x23a   :  { %v1730_v54 = vadd.f32 %v2015_v48, %v3124_v9 }
 0x23b   :  { %v2017_v29 = vpop.f32.mrf.mxu0 }
 0x23c   :  { %1790 = vst [vmem:[%s3195_s5 + $0x8] sm:$0xff] %v1730_v54  ;;  %v2018_v38 = vadd.f32 %v2017_v29, %v2016_v42 }
 0x23d   :  { %v2019_v14 = vpop.f32.mrf.mxu0 }
 0x23e   :  { %v1735_v35 = vadd.f32 %v2018_v38, %v3124_v9 }
 0x23f   :  { %v2020_v19 = vpop.f32.mrf.mxu0 }
 0x240   :  { %1791 = vst [vmem:[%s3195_s5 + $0x10] sm:$0xff] %v1735_v35  ;;  %v2021_v55 = vadd.f32 %v2020_v19, %v2019_v14 }
 0x241   :  { %v2022_v33 = vpop.f32.mrf.mxu0 }
 0x242   :  { %v1738_v60 = vadd.f32 %v2021_v55, %v3124_v9 }
 0x243   :  { %v2023_v36 = vpop.f32.mrf.mxu0 }
 0x244   :  { %1792 = vst [vmem:[%s3195_s5 + $0x18] sm:$0xff] %v1738_v60  ;;  %v2024_v15 = vadd.f32 %v2023_v36, %v2022_v33 }
 0x245   :  { %v2025_v51 = vpop.f32.mrf.mxu0 }
 0x246   :  { %v1743_v62 = vadd.f32 %v2024_v15, %v3124_v9 }
 0x247   :  { %v2026_v43 = vpop.f32.mrf.mxu0 }
 0x248   :  { %1793 = vst [vmem:[%s3195_s5 + $0x20] sm:$0xff] %v1743_v62  ;;  %v2027_v25 = vadd.f32 %v2026_v43, %v2025_v51 }
 0x249   :  { %v2028_v3 = vpop.f32.mrf.mxu0 }
 0x24a   :  { %v1746_v2 = vadd.f32 %v2027_v25, %v3124_v9 }
 0x24b   :  { %v2029_v22 = vpop.f32.mrf.mxu0 }
 0x24c   :  { %1794 = vst [vmem:[%s3195_s5 + $0x28] sm:$0xff] %v1746_v2  ;;  %v2030_v16 = vadd.f32 %v2029_v22, %v2028_v3 }
 0x24d   :  { %v2031_v61 = vpop.f32.mrf.mxu0 }
 0x24e   :  { %v1751_v46 = vadd.f32 %v2030_v16, %v3124_v9 }
 0x24f   :  { %v2032_v56 = vpop.f32.mrf.mxu0 }
 0x250   :  { %1795 = vst [vmem:[%s3195_s5 + $0x30] sm:$0xff] %v1751_v46  ;;  %v2033_v37 = vadd.f32 %v2032_v56, %v2031_v61 }
 0x251   :  { %v2034_v39 = vpop.f32.mrf.mxu0 }
 0x252   :  { %v1754_v20 = vadd.f32 %v2033_v37, %v3124_v9 }
 0x253   :  { %v2035_v7 = vpop.f32.mrf.mxu0 }
 0x254   :  { %1796 = vst [vmem:[%s3195_s5 + $0x38] sm:$0xff] %v1754_v20  ;;  %v2036_v40 = vadd.f32 %v2035_v7, %v2034_v39 }
 0x255   :  { %v2037_v17 = vpop.f32.mrf.mxu0 }
 0x256   :  { %v1759_v44 = vadd.f32 %v2036_v40, %v3124_v9 }
 0x257   :  { %v2038_v41 = vpop.f32.mrf.mxu0 }
 0x258   :  { %1797 = vst [vmem:[%s3195_s5 + $0x40] sm:$0xff] %v1759_v44  ;;  %v2039_v57 = vadd.f32 %v2038_v41, %v2037_v17 }
 0x259   :  { %v2040_v23 = vpop.f32.mrf.mxu0 }
 0x25a   :  { %v1762_v47 = vadd.f32 %v2039_v57, %v3124_v9 }
 0x25b   :  { %v2041_v53 = vpop.f32.mrf.mxu0 }
 0x25c   :  { %1798 = vst [vmem:[%s3195_s5 + $0x48] sm:$0xff] %v1762_v47  ;;  %v2042_v26 = vadd.f32 %v2041_v53, %v2040_v23 }
 0x25d   :  { %v2043_v21 = vpop.f32.mrf.mxu0 }
 0x25e   :  { %v1767_v0 = vadd.f32 %v2042_v26, %v3124_v9 }
 0x25f   :  { %v2044_v45 = vpop.f32.mrf.mxu0 }
 0x260   :  { %1799 = vst [vmem:[%s3195_s5 + $0x50] sm:$0xff] %v1767_v0  ;;  %v2045_v52 = vadd.f32 %v2044_v45, %v2043_v21 }
 0x261   :  { %v2046_v6 = vpop.f32.mrf.mxu0 }
 0x262   :  { %v1770_v12 = vadd.f32 %v2045_v52, %v3124_v9 }
 0x263   :  { %v2047_v13 = vpop.f32.mrf.mxu0 }
 0x264   :  { %1800 = vst [vmem:[%s3195_s5 + $0x58] sm:$0xff] %v1770_v12  ;;  %v2048_v1 = vadd.f32 %v2047_v13, %v2046_v6 }
 0x265   :  { %v2049_v31 = vpop.f32.mrf.mxu0 }
 0x266   :  { %v1775_v50 = vadd.f32 %v2048_v1, %v3124_v9 }
 0x267   :  { %v2050_v30 = vpop.f32.mrf.mxu0 }
 0x268   :  { %1801 = vst [vmem:[%s3195_s5 + $0x60] sm:$0xff] %v1775_v50  ;;  %v2051_v63 = vadd.f32 %v2050_v30, %v2049_v31 }
 0x269   :  { %v2052_v27 = vpop.f32.mrf.mxu0 }
 0x26a   :  { %v1778_v58 = vadd.f32 %v2051_v63, %v3124_v9 }
 0x26b   :  { %v2053_v10 = vpop.f32.mrf.mxu0 }
 0x26c   :  { %1802 = vst [vmem:[%s3195_s5 + $0x68] sm:$0xff] %v1778_v58  ;;  %v2054_v8 = vadd.f32 %v2053_v10, %v2052_v27 }
 0x26d   :  { %v2055_v34 = vpop.f32.mrf.mxu0 }
 0x26e   :  { %v1783_v5 = vadd.f32 %v2054_v8, %v3124_v9 }
 0x26f   :  { %v2056_v4 = vpop.f32.mrf.mxu0 }
 0x270   :  { %1803 = vst [vmem:[%s3195_s5 + $0x70] sm:$0xff] %v1783_v5  ;;  %v2057_v59 = vadd.f32 %v2056_v4, %v2055_v34 }
 0x272   :  { %v1786_v11 = vadd.f32 %v2057_v59, %v3124_v9 }
 0x274   :  { %1804 = vst [vmem:[%s3195_s5 + $0x78] sm:$0xff] %v1786_v11 }

</bundles_post_ra>
